<compile_context>
chip_gen: v7x
topology: tpu7x:2x2x1
jax: 0.10.0
libtpu: 0.0.40
codegen_flags: <defaults>
</compile_context>

<pallas_src>
import numpy as np

import jax
import jax.numpy as jnp
from jax.experimental import pallas as pl
from jax.experimental.pallas import tpu as pltpu


OUT_DIM = 75          # fixed by the module: output = zeros(B, 75)
HID_PAD = 8           # group-0 hidden width padded 5 -> 8 (one sublane group)


# ---------------------------------------------------------------------------
# Kernel
# ---------------------------------------------------------------------------
def _rsna7_kernel(x_ref, wa_ref, ba_ref, wb_ref, wrest_ref, bout_ref, o_ref):
    x = x_ref[...]                                                  # [TB, F_in] bf16

    # Group 0: Linear(5,5) -> ReLU (gather of x[:, k0] folded into Wa).
    h = jnp.dot(x, wa_ref[...], preferred_element_type=jnp.float32)
    h = jnp.maximum(h + ba_ref[...], 0.0)                           # [TB, 8] f32

    # All bias-free groups (i>=1), gathers+scatters folded into Wrest, plus
    # group 0's second Linear(5,5) + scatter folded into Wb / bout.
    out = jnp.dot(x, wrest_ref[...], preferred_element_type=jnp.float32)
    out = out + jnp.dot(h.astype(jnp.bfloat16), wb_ref[...],
                        preferred_element_type=jnp.float32)
    out = out + bout_ref[...]                                       # [TB, Ow] f32

    o_ref[...] = out.astype(o_ref.dtype)


# ---------------------------------------------------------------------------
# Batch-tile selection
# ---------------------------------------------------------------------------
def _pick_tb(B, *, cap=4096, min_tile=16, min_split=128):
    """Pick the batch tile.

    - >= 2 (ideally 4) grid steps so v7x's two TensorCores and the DMA pipeline
      are actually used,
    - >= min_split rows/step to amortize the ~0.35us per-step overhead,
    - capped at `cap` so double-buffered tiles stay far below scoped VMEM on
      every generation (v5e/v6e/v7x).
    """
    if B <= 2 * min_tile:
        return max(B, 1)
    tb = max(min(cap, B // 4), min_split)
    tb = min(tb, B)
    tb = max((tb // min_tile) * min_tile, min_tile)
    return tb


# ---------------------------------------------------------------------------
# Wrapper
# ---------------------------------------------------------------------------
def mlp_rsna7_forward(x, folded, *, tb=None, out_dtype=jnp.bfloat16):
    """x: [B, F_in], folded: dict from fold_params(). Returns [B, out_width]."""
    B, F_in = x.shape
    Hp = folded["wa"].shape[1]
    Ow = folded["w_rest"].shape[1]

    x = x.astype(jnp.bfloat16)
    if tb is None:
        tb = _pick_tb(B)
    n_tiles = int(pl.cdiv(B, tb))
    B_pad = n_tiles * tb
    if B_pad != B:                                  # ragged batch: pad, slice back
        x = jnp.pad(x, ((0, B_pad - B), (0, 0)))

    out = pl.pallas_call(
        _rsna7_kernel,
        out_shape=jax.ShapeDtypeStruct((B_pad, Ow), out_dtype),
        grid=(n_tiles,),
        in_specs=[
            pl.BlockSpec((tb, F_in), lambda i: (i, 0)),    # x     : batch-tiled
            pl.BlockSpec((F_in, Hp), lambda i: (0, 0)),    # Wa    : resident
            pl.BlockSpec((1, Hp),    lambda i: (0, 0)),    # ba    : resident
            pl.BlockSpec((Hp, Ow),   lambda i: (0, 0)),    # Wb    : resident
            pl.BlockSpec((F_in, Ow), lambda i: (0, 0)),    # Wrest : resident
            pl.BlockSpec((1, Ow),    lambda i: (0, 0)),    # bout  : resident
        ],
        out_specs=pl.BlockSpec((tb, Ow), lambda i: (i, 0)),
        compiler_params=pltpu.CompilerParams(
            dimension_semantics=("parallel",),
        ),
    )(x, folded["wa"], folded["ba"], folded["wb"], folded["w_rest"], folded["b_out"])

    if B_pad != B:
        out = out[:B]
    return out


# ---------------------------------------------------------------------------
# Host-side parameter folding
# ---------------------------------------------------------------------------
def fold_params(params, in_out_map, input_num,
                out_dim=OUT_DIM, out_width=OUT_DIM, hid_pad=HID_PAD):
    """Fold gathers/scatters + all linears into dense matrices.

    out_width defaults to 75 (kernel writes the exact output, no pad+slice
    pass). A downstream consumer that wants a lane-dense layout can fold with
    out_width=128 and keep using the padded tensor.
    Weights are stored bf16 (MXU-native on all gens), biases stay f32.
    """
    all_v = [c for (_, v) in in_out_map for c in v]
    assert len(all_v) == len(set(all_v)), "overlapping output index sets"
    assert max(all_v) < out_dim <= out_width
    assert max(c for (k, _) in in_out_map for c in k) < input_num

    wa = np.zeros((input_num, hid_pad), np.float32)
    ba = np.zeros((1, hid_pad), np.float32)
    wb = np.zeros((hid_pad, out_width), np.float32)
    w_rest = np.zeros((input_num, out_width), np.float32)
    b_out = np.zeros((1, out_width), np.float32)

    # Group 0: Linear(5,5) -> ReLU -> Linear(5,5), scattered to v0.
    k0, v0 = in_out_map[0]
    p0 = params[0]
    w1 = np.asarray(p0["w1"])   # (5, 5) torch layout: (out, in)
    b1 = np.asarray(p0["b1"])   # (5,)
    w2 = np.asarray(p0["w2"])   # (5, 5)
    b2 = np.asarray(p0["b2"])   # (5,)
    for j in range(5):                          # hidden unit j
        for a in range(5):                      # input slot a -> column k0[a]
            wa[k0[a], j] = w1[j, a]
        ba[0, j] = b1[j]
    for b in range(5):                          # output unit b -> column v0[b]
        for j in range(5):
            wb[j, v0[b]] = w2[b, j]
        b_out[0, v0[b]] = b2[b]

    # Groups i>=1: bias-free Linear(len(k), len(v)), scattered to v.
    for n, (k, v) in enumerate(in_out_map):
        if n == 0:
            continue
        w = np.asarray(params[n]["w"])          # (len(v), len(k)) torch layout
        for bi, vcol in enumerate(v):
            for ai, kcol in enumerate(k):
                w_rest[kcol, vcol] = w[bi, ai]

    return {
        "wa": jnp.asarray(wa, jnp.bfloat16),
        "ba": jnp.asarray(ba, jnp.float32),
        "wb": jnp.asarray(wb, jnp.bfloat16),
        "w_rest": jnp.asarray(w_rest, jnp.bfloat16),
        "b_out": jnp.asarray(b_out, jnp.float32),
    }


# ---------------------------------------------------------------------------
# Synthetic params + pure-JAX reference
# ---------------------------------------------------------------------------
def init_params(key, in_out_map):
    """Deterministic synthetic parameters matching the nn.Module layout."""
    k0, v0 = in_out_map[0]
    assert len(k0) == 5 and len(v0) == 5
    n_rest = len(in_out_map) - 1
    keys = jax.random.split(key, 4 + max(n_rest, 1))

    params = [{
        "w1": jax.random.normal(keys[0], (5, 5), jnp.float32) * 0.3,
        "b1": jax.random.normal(keys[1], (5,), jnp.float32) * 0.1,
        "w2": jax.random.normal(keys[2], (5, 5), jnp.float32) * 0.3,
        "b2": jax.random.normal(keys[3], (5,), jnp.float32) * 0.1,
    }]
    for n, (k, v) in enumerate(in_out_map):
        if n == 0:
            continue
        w = jax.random.normal(keys[3 + n], (len(v), len(k)), jnp.float32) * 0.3
        params.append({"w": w})
    return params


def mlp_rsna7_reference(x, params, in_out_map, out_dim=OUT_DIM):
    """Direct (unfused) f32 translation of the PyTorch forward, eval semantics."""
    out = jnp.zeros((x.shape[0], out_dim), jnp.float32)
    for i, (k, v) in enumerate(in_out_map):
        xi = x[:, jnp.asarray(k)]
        if i == 0:
            p = params[0]
            h = jnp.maximum(xi @ p["w1"].T + p["b1"], 0.0)
            o = h @ p["w2"].T + p["b2"]
        else:
            o = xi @ params[i]["w"].T
        out = out.at[:, jnp.asarray(v)].set(o)
    return out


# ---------------------------------------------------------------------------
if __name__ == "__main__":
    key = jax.random.PRNGKey(0)
    k_x, k_p = jax.random.split(key)

    INPUT_NUM = 20
    # Group 0 is the 5->5->5 MLP; the rest are bias-free linears writing
    # disjoint slices of the 75-wide output.
    in_out_map = [
        ([0, 1, 2, 3, 4], [0, 1, 2, 3, 4]),
        ([5, 6, 7], [5, 6, 7, 8, 9, 10]),
        ([8, 9, 10, 11], [20, 21, 22]),
        ([12, 13, 14, 15, 16, 17, 18, 19],
         [40, 41, 42, 43, 44, 45, 46, 47, 48, 49]),
    ]

    params = init_params(k_p, in_out_map)
    folded = fold_params(params, in_out_map, INPUT_NUM)

    # Test 1: multi-step grid (B=256 -> tb=128, grid=(2,)).
    B1 = 256
    x1 = jax.random.normal(k_x, (B1, INPUT_NUM), jnp.float32)
    out1 = jax.block_until_ready(mlp_rsna7_forward(x1, folded))
    ref1 = mlp_rsna7_reference(x1, params, in_out_map)
    assert out1.shape == (B1, OUT_DIM)
    assert jnp.allclose(out1.astype(jnp.float32), ref1, atol=5e-2, rtol=5e-2), \
        "mismatch vs reference (grid=2)"

    # Test 2: ragged batch path (B=200 -> padded to 256, sliced back).
    B2 = 200
    x2 = x1[:B2]
    out2 = jax.block_until_ready(mlp_rsna7_forward(x2, folded))
    ref2 = mlp_rsna7_reference(x2, params, in_out_map)
    assert out2.shape == (B2, OUT_DIM)
    assert jnp.allclose(out2.astype(jnp.float32), ref2, atol=5e-2, rtol=5e-2), \
        "mismatch vs reference (ragged B)"

    print("KERNEL_OK")
</pallas_src>

<mosaic_0001>
module attributes {stable_mosaic.version = 11 : i64} {
  func.func @_rsna7_kernel(%arg0: i32, %arg1: memref<128x20xbf16, #tpu.memory_space<vmem>>, %arg2: memref<20x8xbf16, #tpu.memory_space<vmem>>, %arg3: memref<1x8xf32, #tpu.memory_space<vmem>>, %arg4: memref<8x75xbf16, #tpu.memory_space<vmem>>, %arg5: memref<20x75xbf16, #tpu.memory_space<vmem>>, %arg6: memref<1x75xf32, #tpu.memory_space<vmem>>, %arg7: memref<128x75xbf16, #tpu.memory_space<vmem>>) attributes {dimension_semantics = [#tpu.dimension_semantics<parallel>], iteration_bounds = array<i64: 2>, scalar_prefetch = 0 : i64, scratch_operands = 0 : i64, tpu.core_type = #tpu.core_type<tc>, window_params = [{transform_indices = @transform_0, window_bounds = array<i64: 128, 20>}, {pipeline_mode = #tpu.pipeline_mode<synchronous>, transform_indices = @transform_1, window_bounds = array<i64: 20, 8>}, {pipeline_mode = #tpu.pipeline_mode<synchronous>, transform_indices = @transform_2, window_bounds = array<i64: 1, 8>}, {pipeline_mode = #tpu.pipeline_mode<synchronous>, transform_indices = @transform_3, window_bounds = array<i64: 8, 75>}, {pipeline_mode = #tpu.pipeline_mode<synchronous>, transform_indices = @transform_4, window_bounds = array<i64: 20, 75>}, {pipeline_mode = #tpu.pipeline_mode<synchronous>, transform_indices = @transform_5, window_bounds = array<i64: 1, 75>}, {transform_indices = @transform_6, window_bounds = array<i64: 128, 75>}]} {
    %c0 = arith.constant 0 : index
    %c0_0 = arith.constant 0 : index
    %0 = vector.load %arg1[%c0, %c0_0] : memref<128x20xbf16, #tpu.memory_space<vmem>>, vector<128x20xbf16>
    %c0_1 = arith.constant 0 : index
    %c0_2 = arith.constant 0 : index
    %1 = vector.load %arg2[%c0_1, %c0_2] : memref<20x8xbf16, #tpu.memory_space<vmem>>, vector<20x8xbf16>
    %cst = arith.constant dense<0.000000e+00> : vector<128x8xf32>
    %2 = tpu.matmul %0, %1, %cst {dimension_numbers = #tpu.dot_dimension_numbers<[1], [0], [0], [1], [0, 0, 1, 1], [], []>} : vector<128x20xbf16>, vector<20x8xbf16>, vector<128x8xf32> -> vector<128x8xf32>
    %c0_3 = arith.constant 0 : index
    %c0_4 = arith.constant 0 : index
    %3 = vector.load %arg3[%c0_3, %c0_4] : memref<1x8xf32, #tpu.memory_space<vmem>>, vector<1x8xf32>
    %4 = vector.broadcast %3 : vector<1x8xf32> to vector<128x8xf32>
    %5 = arith.addf %2, %4 : vector<128x8xf32>
    %cst_5 = arith.constant 0.000000e+00 : f32
    %6 = vector.broadcast %cst_5 : f32 to vector<128x8xf32>
    %7 = arith.maximumf %5, %6 : vector<128x8xf32>
    %c0_6 = arith.constant 0 : index
    %c0_7 = arith.constant 0 : index
    %8 = vector.load %arg5[%c0_6, %c0_7] : memref<20x75xbf16, #tpu.memory_space<vmem>>, vector<20x75xbf16>
    %cst_8 = arith.constant dense<0.000000e+00> : vector<128x75xf32>
    %9 = tpu.matmul %0, %8, %cst_8 {dimension_numbers = #tpu.dot_dimension_numbers<[1], [0], [0], [1], [0, 0, 1, 1], [], []>} : vector<128x20xbf16>, vector<20x75xbf16>, vector<128x75xf32> -> vector<128x75xf32>
    %10 = arith.truncf %7 : vector<128x8xf32> to vector<128x8xbf16>
    %c0_9 = arith.constant 0 : index
    %c0_10 = arith.constant 0 : index
    %11 = vector.load %arg4[%c0_9, %c0_10] : memref<8x75xbf16, #tpu.memory_space<vmem>>, vector<8x75xbf16>
    %cst_11 = arith.constant dense<0.000000e+00> : vector<128x75xf32>
    %12 = tpu.matmul %10, %11, %cst_11 {dimension_numbers = #tpu.dot_dimension_numbers<[1], [0], [0], [1], [0, 0, 1, 1], [], []>} : vector<128x8xbf16>, vector<8x75xbf16>, vector<128x75xf32> -> vector<128x75xf32>
    %13 = arith.addf %9, %12 : vector<128x75xf32>
    %c0_12 = arith.constant 0 : index
    %c0_13 = arith.constant 0 : index
    %14 = vector.load %arg6[%c0_12, %c0_13] : memref<1x75xf32, #tpu.memory_space<vmem>>, vector<1x75xf32>
    %15 = vector.broadcast %14 : vector<1x75xf32> to vector<128x75xf32>
    %16 = arith.addf %13, %15 : vector<128x75xf32>
    %17 = arith.truncf %16 : vector<128x75xf32> to vector<128x75xbf16>
    %c0_14 = arith.constant 0 : index
    %c0_15 = arith.constant 0 : index
    %18 = vector.load %arg7[%c0_14, %c0_15] : memref<128x75xbf16, #tpu.memory_space<vmem>>, vector<128x75xbf16>
    tpu.vector_store %arg7[%c0_14, %c0_15], %17 {strides = array<i32>} : memref<128x75xbf16, #tpu.memory_space<vmem>>, vector<128x75xbf16>,
    return
  }
  func.func @transform_0(%arg0: i32) -> (i32, i32) {
    %c0_i32 = arith.constant 0 : i32
    %c0_i32_0 = arith.constant 0 : i32
    return %arg0, %c0_i32 : i32, i32
  }
  func.func @transform_1(%arg0: i32) -> (i32, i32) {
    %c0_i32 = arith.constant 0 : i32
    %c0_i32_0 = arith.constant 0 : i32
    %c0_i32_1 = arith.constant 0 : i32
    return %c0_i32, %c0_i32_0 : i32, i32
  }
  func.func @transform_2(%arg0: i32) -> (i32, i32) {
    %c0_i32 = arith.constant 0 : i32
    %c0_i32_0 = arith.constant 0 : i32
    %c0_i32_1 = arith.constant 0 : i32
    return %c0_i32, %c0_i32_0 : i32, i32
  }
  func.func @transform_3(%arg0: i32) -> (i32, i32) {
    %c0_i32 = arith.constant 0 : i32
    %c0_i32_0 = arith.constant 0 : i32
    %c0_i32_1 = arith.constant 0 : i32
    return %c0_i32, %c0_i32_0 : i32, i32
  }
  func.func @transform_4(%arg0: i32) -> (i32, i32) {
    %c0_i32 = arith.constant 0 : i32
    %c0_i32_0 = arith.constant 0 : i32
    %c0_i32_1 = arith.constant 0 : i32
    return %c0_i32, %c0_i32_0 : i32, i32
  }
  func.func @transform_5(%arg0: i32) -> (i32, i32) {
    %c0_i32 = arith.constant 0 : i32
    %c0_i32_0 = arith.constant 0 : i32
    %c0_i32_1 = arith.constant 0 : i32
    return %c0_i32, %c0_i32_0 : i32, i32
  }
  func.func @transform_6(%arg0: i32) -> (i32, i32) {
    %c0_i32 = arith.constant 0 : i32
    %c0_i32_0 = arith.constant 0 : i32
    return %arg0, %c0_i32 : i32, i32
  }
}

</mosaic_0001>

<bundles_post_ra>
// kernel: tpu_custom_call.1
= control target key start
LH: loop header
LB: loop body
LE: loop exit
PB: predicated region body
PF: predicated region fallthrough
CT: control target
= control target key end

     0   :  { %s1133_s21 = smov 0   ;;  %s1290_s0 = inlined_call_operand.vmem [shape: bf16[256,20], index: 0, kind: input, shape index: {}]   ;;  %s1291_s1 = inlined_call_operand.vmem [shape: bf16[20,8], index: 1, kind: input, shape index: {}]   ;;  %s1292_s2 = inlined_call_operand.vmem [shape: f32[1,8], index: 2, kind: input, shape index: {}]   ;;  %s1293_s3 = inlined_call_operand.vmem [shape: bf16[8,75], index: 3, kind: input, shape index: {}]   ;;  %s1294_s4 = inlined_call_operand.vmem [shape: bf16[20,75], index: 4, kind: input, shape index: {}]   ;;  %s1295_s5 = inlined_call_operand.vmem [shape: f32[1,75], index: 5, kind: input, shape index: {}]   ;;  %s1296_s6 = inlined_call_operand.vmem [shape: bf16[256,75], index: 6, kind: output, shape index: {}]  }
   0x1 LB: > { %s880_s22 = sadd.s32 4294967295, %s1096_s21   ;;  %p884_p0 = scmp.ge.s32.totalorder %s1096_s21, 1  ;;  %s1096_s21 = sphi %s1133_s21, %s16_s21  }
   0x2   : > { %p213_p1 = scmp.lt.s32.totalorder %s1096_s21, 3 }
   0x4   : > { %p214_p2 = pnand %p884_p0, %p213_p1 }
   0x5   : > { %v1078_v0 = vld [vmem:[%s1291_s1] sm:$0xff] (!%p214_p2)   ;;  %vm356_vm0 = vcmask (!%p214_p2), 1041408   ;;  %v1079_v1 = vld [vmem:[%s1291_s1 + $0x8] ss:$0 sps:$4 sm:$0x33] (!%p214_p2)   ;;  %s885_s27 = sshll.u32 (!%p214_p2), %s880_s22, 4 }
   0x6   : > { %217 = sbr.rel (%p214_p2) target bundleno = 516 (0x204), region = 44  ;;  %990 = vmatprep.subr.bf16.mxu0 (!%p214_p2), %v1078_v0  ;;  %p244_p3 = scmp.lt.s32.totalorder (!%p214_p2), %s885_s27, 31  ;;  %v358_v2 = vsel (!%p214_p2), %vm356_vm0, %v1079_v1, 0  ;;  %vm331_vm1 = vcmask (!%p214_p2), 162816   ;;  %v484_v11 = vld [vmem:[%s1293_s3] sm:$0xf] (!%p214_p2) }
   0x7   : > { %991 = vmatpush3.bf16.msra.mxu0 (!%p214_p2), %v1078_v0  ;;  %vm510_vm2 = vcmask (!%p214_p2), 1043456   ;;  %v1088_v13 = vld [vmem:[%s1294_s4] sm:$0xff] (!%p214_p2)   ;;  %vm485_vm3 = vcmask (!%p214_p2), 64512   ;;  %v1089_v46 = vld [vmem:[%s1294_s4 + $0x8] ss:$0 sps:$4 sm:$0x33] (!%p214_p2)  }
   0x8   : > { %1066 = vmatprep.subr.msk.bf16.mxu0 (!%p214_p2), %vm356_vm0, %v1079_v1  ;;  %v512_v12 = vsel (!%p214_p2), %vm510_vm2, %v484_v11, 0  ;;  %1068 = vmatprep.subr.msk.bf16.mxu1 (!%p214_p2), %vm510_vm2, %v484_v11  ;;  %v889_v14 = vld [vmem:[%s1292_s2] ss:$0 sm:$0xff] (!%p214_p2)  ;;  %v621_v54 = vsel (!%p214_p2), %vm356_vm0, %v1089_v46, 0  ;;  %vm807_vm4 = vcmask (!%p214_p2), 609280  }
   0x9   : > { %1049 = vmatpush3.bf16.msra.mxu1 (!%p214_p2), %v512_v12 }
   0xa   : > { %1028 = vmatprep.subr.bf16.mxu1 (!%p214_p2), %v1088_v13 }
   0xb   : > { %993 = vmatpush3.bf16.msra.mxu0 (!%p214_p2), %v358_v2 }
   0xc   : > { %1067 = vmatprep.subr.msk.bf16.mxu0 (!%p214_p2), %vm510_vm2, %v484_v11 }
   0xd   : > { %s1298_s27 = smov (!%p244_p3, %s885_s27), 31 }
   0xe   : > { %s886_s28 = sshll.u32 %s1298_s27, 2 }
   0xf   : > { %s247_s7 = scalar_lea.vmem %s1290_s0, %s886_s28  ;;  %s1238_s20 = scalar_lea.vmem %s1296_s6, %s886_s28 }
  0x10   : > { %v1157_v3 = vld [vmem:[%s247_s7] sm:$0xff]   ;;  %v1159_v4 = vld [vmem:[%s247_s7 + $0x8] sm:$0xff]   ;;  %v1163_v5 = vld [vmem:[%s247_s7 + $0x10] sm:$0xff]  }
  0x11   : > { %994 = vmatprep.mubr.msk.bf16.mxu0 %vm331_vm1, %v1157_v3  ;;  %v1169_v6 = vld [vmem:[%s247_s7 + $0x18] sm:$0xff]   ;;  %v1171_v7 = vld [vmem:[%s247_s7 + $0x20] sm:$0xff]   ;;  %v1177_v8 = vld [vmem:[%s247_s7 + $0x28] sm:$0xff]  }
  0x12   : > { %995 = vmatmul.mubr.msk.bf16.vlgmr.msra.gmra.mrb[0].mxu0 %vm331_vm1, %v1159_v4  ;;  %v1179_v9 = vld [vmem:[%s247_s7 + $0x30] sm:$0xff]   ;;  %v1185_v10 = vld [vmem:[%s247_s7 + $0x38] sm:$0xff]  }
  0x13   : > { %998 = vmatprep.mubr.msk.bf16.mxu0 %vm331_vm1, %v1163_v5  ;;  %1011 = vmatpush3.bf16.msra.mxu0 %v512_v12 }
  0x1a   : > { %999 = vmatmul.mubr.msk.bf16.gmra.mrb[4].mxu0 %vm331_vm1, %v1169_v6 }
  0x1b   : > { %1002 = vmatprep.mubr.msk.bf16.mxu0 %vm331_vm1, %v1171_v7 }
  0x22   : > { %1003 = vmatmul.mubr.msk.bf16.gmra.mrb[8].mxu0 %vm331_vm1, %v1177_v8 }
  0x23   : > { %1006 = vmatprep.mubr.msk.bf16.mxu0 %vm331_vm1, %v1179_v9 }
  0x2a   : > { %1007 = vmatmul.mubr.msk.bf16.gmra.mrb[12].mxu0 %vm331_vm1, %v1185_v10 }
  0xe5   : > { %v996_v15 = vpop.f32.mrb[0].mxu0 }
  0xe6   : > { %v403_v16 = vadd.f32 %v996_v15, %v889_v14  ;;  %v394_v17 = vpop.f32.mrb[1].mxu0 }
  0xe7   : > { %v395_v18 = vadd.f32 %v889_v14, %v394_v17  ;;  %v997_v19 = vpop.f32.mrb[2].mxu0 }
  0xe8   : > { %v406_v20 = vadd.f32 %v997_v19, %v889_v14  ;;  %v397_v21 = vpop.f32.mrb[3].mxu0  ;;  %v459_v23 = vmax.f32 %v403_v16, 0.0 }
  0xe9   : > { %v398_v22 = vadd.f32 %v889_v14, %v397_v21  ;;  %v457_v25 = vmax.f32 %v395_v18, 0.0 }
  0xea   : > { %v460_v24 = vmax.f32 %v406_v20, 0.0 }
  0xeb   : > { %v458_v26 = vmax.f32 %v398_v22, 0.0 }
  0xec   : > { %v477_v27 = vpack.c.bf16 %v460_v24, %v459_v23 }
  0xed   : > { %v476_v28 = vpack.c.bf16 %v458_v26, %v457_v25  ;;  %v1000_v29 = vpop.f32.mrb[4].mxu0 }
  0xee   : > { %v419_v30 = vadd.f32 %v1000_v29, %v889_v14  ;;  %v410_v31 = vpop.f32.mrb[5].mxu0 }
  0xef   : > { %v411_v32 = vadd.f32 %v889_v14, %v410_v31  ;;  %v1001_v33 = vpop.f32.mrb[6].mxu0  ;;  %1012 = vmatprep.mubr.msk.bf16.mxu0 %vm485_vm3, %v476_v28 }
  0xf0   : > { %v422_v34 = vadd.f32 %v1001_v33, %v889_v14  ;;  %v413_v35 = vpop.f32.mrb[7].mxu0  ;;  %1013 = vmatmul.mubr.msk.bf16.vlgmr.msra.gmra.mrb[16].mxu0 %vm485_vm3, %v477_v27  ;;  %v463_v37 = vmax.f32 %v419_v30, 0.0 }
  0xf1   : > { %v414_v36 = vadd.f32 %v889_v14, %v413_v35  ;;  %v461_v39 = vmax.f32 %v411_v32, 0.0 }
  0xf2   : > { %v464_v38 = vmax.f32 %v422_v34, 0.0 }
  0xf3   : > { %v462_v40 = vmax.f32 %v414_v36, 0.0 }
  0xf4   : > { %v479_v41 = vpack.c.bf16 %v464_v38, %v463_v37 }
  0xf5   : > { %v1004_v42 = vpop.f32.mrb[8].mxu0  ;;  %v478_v43 = vpack.c.bf16 %v462_v40, %v461_v39 }
  0xf6   : > { %v435_v44 = vadd.f32 %v1004_v42, %v889_v14  ;;  %v426_v45 = vpop.f32.mrb[9].mxu0 }
  0xf7   : > { %v427_v47 = vadd.f32 %v889_v14, %v426_v45  ;;  %v1005_v48 = vpop.f32.mrb[10].mxu0  ;;  %1016 = vmatprep.mubr.msk.bf16.mxu1 %vm485_vm3, %v478_v43 }
  0xf8   : > { %v438_v49 = vadd.f32 %v1005_v48, %v889_v14  ;;  %v429_v50 = vpop.f32.mrb[11].mxu0  ;;  %1017 = vmatmul.mubr.msk.bf16.vlgmr.msra.gmra.mrb[0].mxu1 %vm485_vm3, %v479_v41  ;;  %v467_v52 = vmax.f32 %v435_v44, 0.0 }
  0xf9   : > { %v430_v51 = vadd.f32 %v889_v14, %v429_v50  ;;  %1029 = vmatpush3.bf16.msra.mxu1 %v1088_v13  ;;  %v465_v55 = vmax.f32 %v427_v47, 0.0 }
  0xfa   : > { %v468_v53 = vmax.f32 %v438_v49, 0.0  ;;  %1069 = vmatprep.subr.msk.bf16.mxu1 %vm356_vm0, %v1089_v46 }
  0xfb   : > { %v466_v56 = vmax.f32 %v430_v51, 0.0 }
  0xfc   : > { %v481_v57 = vpack.c.bf16 %v468_v53, %v467_v52 }
  0xfd   : > { %v480_v58 = vpack.c.bf16 %v466_v56, %v465_v55  ;;  %v1008_v59 = vpop.f32.mrb[12].mxu0  ;;  %1031 = vmatpush3.bf16.msra.mxu1 %v621_v54 }
  0xfe   : > { %v451_v60 = vadd.f32 %v1008_v59, %v889_v14  ;;  %v442_v61 = vpop.f32.mrb[13].mxu0 }
  0xff   : > { %v443_v62 = vadd.f32 %v889_v14, %v442_v61  ;;  %v1009_v63 = vpop.f32.mrb[14].mxu0  ;;  %1020 = vmatprep.mubr.msk.bf16.mxu1 %vm485_vm3, %v480_v58 }
 0x100   : > { %v454_v0 = vadd.f32 %v1009_v63, %v889_v14  ;;  %v445_v1 = vpop.f32.mrb[15].mxu0  ;;  %1021 = vmatmul.mubr.msk.bf16.gmra.mrb[4].mxu1 %vm485_vm3, %v481_v57  ;;  %v471_v11 = vmax.f32 %v451_v60, 0.0 }
 0x101   : > { %v446_v2 = vadd.f32 %v889_v14, %v445_v1  ;;  %v469_v13 = vmax.f32 %v443_v62, 0.0 }
 0x102   : > { %v472_v12 = vmax.f32 %v454_v0, 0.0 }
 0x103   : > { %v470_v15 = vmax.f32 %v446_v2, 0.0 }
 0x104   : > { %v483_v16 = vpack.c.bf16 %v472_v12, %v471_v11 }
 0x105   : > { %v482_v17 = vpack.c.bf16 %v470_v15, %v469_v13 }
 0x107   : > { %1024 = vmatprep.mubr.msk.bf16.mxu1 %vm485_vm3, %v482_v17 }
 0x108   : > { %1025 = vmatmul.mubr.msk.bf16.gmra.mrb[8].mxu1 %vm485_vm3, %v483_v16 }
 0x109   : > { %1032 = vmatprep.mubr.msk.bf16.mxu1 %vm331_vm1, %v1157_v3 }
 0x110   : > { %1033 = vmatmul.mubr.msk.bf16.vlgmr.msra.gmra.mrb[12].mxu1 %vm331_vm1, %v1159_v4 }
 0x111   : > { %1036 = vmatprep.mubr.msk.bf16.mxu1 %vm331_vm1, %v1163_v5 }
 0x118   : > { %1037 = vmatmul.mubr.msk.bf16.gmra.mrb[0].mxu1 %vm331_vm1, %v1169_v6  ;;  %v1230_v6 = vld [vmem:[%s1295_s5] ss:$0 sm:$0xff] }
 0x119   : > { %1040 = vmatprep.mubr.msk.bf16.mxu1 %vm331_vm1, %v1171_v7 }
 0x120   : > { %1041 = vmatmul.mubr.msk.bf16.gmra.mrb[4].mxu1 %vm331_vm1, %v1177_v8 }
 0x121   : > { %1044 = vmatprep.mubr.msk.bf16.mxu1 %vm331_vm1, %v1179_v9 }
 0x128   : > { %1045 = vmatmul.mubr.msk.bf16.gmra.mrb[8].mxu1 %vm331_vm1, %v1185_v10 }
 0x1c3   : > { %v1014_v3 = vpop.f32.mrb[16].mxu0 }
 0x1c4   : > { %v548_v4 = vpop.f32.mrb[17].mxu0 }
 0x1c5   : > { %v1015_v14 = vpop.f32.mrb[18].mxu0 }
 0x1c6   : > { %v551_v5 = vpop.f32.mrb[19].mxu0 }
 0x1e3   : > { %v1034_v18 = vpop.f32.mrb[12].mxu1 }
 0x1e4   : > { %v666_v7 = vadd.f32 %v1034_v18, %v1014_v3  ;;  %v657_v19 = vpop.f32.mrb[13].mxu1 }
 0x1e5   : > { %v658_v8 = vadd.f32 %v657_v19, %v548_v4  ;;  %v1035_v20 = vpop.f32.mrb[14].mxu1 }
 0x1e6   : > { %v729_v21 = vadd.f32 %v1230_v6, %v666_v7  ;;  %v669_v9 = vadd.f32 %v1035_v20, %v1015_v14  ;;  %v660_v22 = vpop.f32.mrb[15].mxu1 }
 0x1e7   : > { %v727_v10 = vadd.f32 %v1230_v6, %v658_v8  ;;  %v661_v23 = vadd.f32 %v660_v22, %v551_v5 }
 0x1e8   : > { %v947_v24 = vpack.c.bf16 %v729_v21, %v729_v21  ;;  %v730_v25 = vadd.f32 %v1230_v6, %v669_v9 }
 0x1e9   : > { %v945_v26 = vpack.c.bf16 %v727_v10, %v727_v10  ;;  %v728_v27 = vadd.f32 %v1230_v6, %v661_v23 }
 0x1ea   : > { %810 = vst.msk [vmem:[%s1238_s20 + $0x8] sm:$0xf] %vm807_vm4, %v947_v24  ;;  %v948_v28 = vpack.c.bf16 %v730_v25, %v730_v25 }
 0x1eb   : > { %808 = vst.msk [vmem:[%s1238_s20] sm:$0xf] %vm807_vm4, %v945_v26  ;;  %v946_v29 = vpack.c.bf16 %v728_v27, %v728_v27  ;;  %v1038_v30 = vpop.f32.mrb[0].mxu1 }
 0x1ec   : > { %811 = vst.msk [vmem:[%s1238_s20 + $0xc] sm:$0xf] %vm807_vm4, %v948_v28  ;;  %v733_v31 = vadd.f32 %v1038_v30, %v1230_v6  ;;  %v673_v32 = vpop.f32.mrb[1].mxu1 }
 0x1ed   : > { %809 = vst.msk [vmem:[%s1238_s20 + $0x4] sm:$0xf] %vm807_vm4, %v946_v29  ;;  %v731_v33 = vadd.f32 %v1230_v6, %v673_v32  ;;  %v1039_v34 = vpop.f32.mrb[2].mxu1 }
 0x1ee   : > { %v951_v35 = vpack.c.bf16 %v733_v31, %v733_v31  ;;  %v734_v36 = vadd.f32 %v1039_v34, %v1230_v6  ;;  %v676_v37 = vpop.f32.mrb[3].mxu1 }
 0x1ef   : > { %v949_v38 = vpack.c.bf16 %v731_v33, %v731_v33  ;;  %v732_v39 = vadd.f32 %v1230_v6, %v676_v37 }
 0x1f0   : > { %814 = vst.msk [vmem:[%s1238_s20 + $0x18] sm:$0xf] %vm807_vm4, %v951_v35  ;;  %v952_v40 = vpack.c.bf16 %v734_v36, %v734_v36 }
 0x1f1   : > { %812 = vst.msk [vmem:[%s1238_s20 + $0x10] sm:$0xf] %vm807_vm4, %v949_v38  ;;  %v950_v41 = vpack.c.bf16 %v732_v39, %v732_v39 }
 0x1f2   : > { %815 = vst.msk [vmem:[%s1238_s20 + $0x1c] sm:$0xf] %vm807_vm4, %v952_v40 }
 0x1f3   : > { %813 = vst.msk [vmem:[%s1238_s20 + $0x14] sm:$0xf] %vm807_vm4, %v950_v41  ;;  %v1042_v42 = vpop.f32.mrb[4].mxu1 }
 0x1f4   : > { %v737_v43 = vadd.f32 %v1042_v42, %v1230_v6  ;;  %v689_v44 = vpop.f32.mrb[5].mxu1 }
 0x1f5   : > { %v735_v45 = vadd.f32 %v1230_v6, %v689_v44  ;;  %v1043_v46 = vpop.f32.mrb[6].mxu1 }
 0x1f6   : > { %v955_v47 = vpack.c.bf16 %v737_v43, %v737_v43  ;;  %v738_v48 = vadd.f32 %v1043_v46, %v1230_v6  ;;  %v692_v49 = vpop.f32.mrb[7].mxu1 }
 0x1f7   : > { %v953_v50 = vpack.c.bf16 %v735_v45, %v735_v45  ;;  %v736_v51 = vadd.f32 %v1230_v6, %v692_v49 }
 0x1f8   : > { %818 = vst.msk [vmem:[%s1238_s20 + $0x28] sm:$0xf] %vm807_vm4, %v955_v47  ;;  %v956_v52 = vpack.c.bf16 %v738_v48, %v738_v48 }
 0x1f9   : > { %816 = vst.msk [vmem:[%s1238_s20 + $0x20] sm:$0xf] %vm807_vm4, %v953_v50  ;;  %v954_v53 = vpack.c.bf16 %v736_v51, %v736_v51 }
 0x1fa   : > { %819 = vst.msk [vmem:[%s1238_s20 + $0x2c] sm:$0xf] %vm807_vm4, %v956_v52 }
 0x1fb   : > { %817 = vst.msk [vmem:[%s1238_s20 + $0x24] sm:$0xf] %vm807_vm4, %v954_v53  ;;  %v1046_v54 = vpop.f32.mrb[8].mxu1 }
 0x1fc   : > { %v741_v55 = vadd.f32 %v1046_v54, %v1230_v6  ;;  %v705_v56 = vpop.f32.mrb[9].mxu1 }
 0x1fd   : > { %v739_v57 = vadd.f32 %v1230_v6, %v705_v56  ;;  %v1047_v58 = vpop.f32.mrb[10].mxu1 }
 0x1fe   : > { %v959_v59 = vpack.c.bf16 %v741_v55, %v741_v55  ;;  %v742_v60 = vadd.f32 %v1047_v58, %v1230_v6  ;;  %v708_v61 = vpop.f32.mrb[11].mxu1 }
 0x1ff   : > { %v957_v62 = vpack.c.bf16 %v739_v57, %v739_v57  ;;  %v740_v63 = vadd.f32 %v1230_v6, %v708_v61 }
 0x200   : > { %822 = vst.msk [vmem:[%s1238_s20 + $0x38] sm:$0xf] %vm807_vm4, %v959_v59  ;;  %v960_v0 = vpack.c.bf16 %v742_v60, %v742_v60 }
 0x201   : > { %820 = vst.msk [vmem:[%s1238_s20 + $0x30] sm:$0xf] %vm807_vm4, %v957_v62  ;;  %v958_v1 = vpack.c.bf16 %v740_v63, %v740_v63 }
 0x202   : > { %823 = vst.msk [vmem:[%s1238_s20 + $0x3c] sm:$0xf] %vm807_vm4, %v960_v0 }
 0x203   : > { %821 = vst.msk [vmem:[%s1238_s20 + $0x34] sm:$0xf] %vm807_vm4, %v958_v1 }
 0x204 PF: > { %s16_s21 = sadd.s32 1, %s1096_s21  }
 0x205   : > { %p13_p4 = scmp.ge.s32.totalorder %s16_s21, 4  }
 0x207   :  { %15 = sbr.rel (!%p13_p4) target bundleno = 1 (0x1), region = 74 }

</bundles_post_ra>
